<compile_context>
chip_gen: v6e
topology: v6e:2x2x1
jax: 0.10.0
libtpu: 0.0.40
codegen_flags: <defaults>
</compile_context>

<pallas_src>
import functools
import numpy as np

import jax
import jax.numpy as jnp
from jax.experimental import pallas as pl
from jax.experimental.pallas import tpu as pltpu


def _add_pe_kernel(x_ref, pe_ref, o_ref):
    # Pure VPU elementwise add: blocks of x, pe and out have identical shapes.
    o_ref[...] = x_ref[...] + pe_ref[...]


def _build_pe(M: int, D: int, max_tokens: int, dtype) -> jax.Array:
    """Sin/cos table, computed once with plain jnp (outside the kernel)."""
    pos = jnp.arange(M, dtype=jnp.float32)[:, None]                      # (M, 1)
    div = jnp.exp(jnp.arange(0, D, 2, dtype=jnp.float32)
                  * (-np.log(max_tokens) / D))                           # (D/2,)
    ang = pos * div                                                      # (M, D/2)
    # Interleave: columns 0::2 = sin, 1::2 = cos.
    pe = jnp.stack([jnp.sin(ang), jnp.cos(ang)], axis=-1).reshape(M, D)
    # Cast once here so the in-kernel add is cast-free (matters for bf16/v5e).
    return pe.astype(dtype)


@functools.partial(jax.jit, static_argnames=("max_tokens",))
def discrete_sincos_pos_enc(x: jax.Array, max_tokens: int) -> jax.Array:
    """Forward pass of DiscreteSinCosPositionalEncoding (dropout p=0)."""
    B, M, D = x.shape
    assert D % 2 == 0, "d_model must be even."

    pe = _build_pe(M, D, max_tokens, x.dtype)
    P = M * D

    if P % 128 == 0:
        # ---- Lane-dense path: fold (M, D) -> (R, 128), R = M*D/128. ----
        R = P // 128
        xv = x.reshape(B, R, 128)          # contiguous regroup: free bitcast
        pev = pe.reshape(1, R, 128)
        # ~1 MiB (f32) blocks; full extent when R is small (valid block shape).
        TR = R if R <= 2048 else 2048
        grid = (pl.cdiv(R, TR), B)         # batch innermost -> pe tile reused
        out = pl.pallas_call(
            _add_pe_kernel,
            out_shape=jax.ShapeDtypeStruct((B, R, 128), x.dtype),
            grid=grid,
            in_specs=[
                pl.BlockSpec((1, TR, 128), lambda r, b: (b, r, 0)),
                pl.BlockSpec((1, TR, 128), lambda r, b: (0, r, 0)),  # b-invariant
            ],
            out_specs=pl.BlockSpec((1, TR, 128), lambda r, b: (b, r, 0)),
            compiler_params=pltpu.CompilerParams(
                dimension_semantics=("parallel", "parallel")),
        )(xv, pev)
        return out.reshape(B, M, D)

    # ---- Fallback path (M*D not 128-aligned): tile the token axis. ----
    TM = M if M <= 512 else 512            # 512 is a multiple of 8; else full dim
    grid = (pl.cdiv(M, TM), B)             # batch innermost -> pe tile reused
    pev = pe.reshape(1, M, D)
    return pl.pallas_call(
        _add_pe_kernel,
        out_shape=jax.ShapeDtypeStruct((B, M, D), x.dtype),
        grid=grid,
        in_specs=[
            pl.BlockSpec((1, TM, D), lambda m, b: (b, m, 0)),
            pl.BlockSpec((1, TM, D), lambda m, b: (0, m, 0)),        # b-invariant
        ],
        out_specs=pl.BlockSpec((1, TM, D), lambda m, b: (b, m, 0)),
        compiler_params=pltpu.CompilerParams(
            dimension_semantics=("parallel", "parallel")),
    )(x, pev)


def _reference(x: np.ndarray, max_tokens: int) -> np.ndarray:
    """Pure-numpy reproduction of the PyTorch module for verification."""
    _, M, D = x.shape
    position = np.arange(M)[:, None].astype(np.float64)
    div_term = np.exp(np.arange(0, D, 2) * (-np.log(max_tokens) / D))
    pe = np.zeros((1, M, D), dtype=np.float64)
    pe[0, :, 0::2] = np.sin(position * div_term)
    pe[0, :, 1::2] = np.cos(position * div_term)
    return (x.astype(np.float64) + pe).astype(x.dtype)


if __name__ == "__main__":
    # Module init shapes: d_model=32, t of shape (B, M, 1) just provides M.
    B, M, D = 2, 8, 32
    max_tokens = 100

    key = jax.random.PRNGKey(0)
    x = jax.random.normal(key, (B, M, D), dtype=jnp.float32)

    out = discrete_sincos_pos_enc(x, max_tokens)
    out = jax.block_until_ready(out)

    ref = _reference(np.asarray(x), max_tokens)
    np.testing.assert_allclose(np.asarray(out), ref, atol=1e-5, rtol=1e-5)

    print("KERNEL_OK")
</pallas_src>

<mosaic_0001>
module attributes {stable_mosaic.version = 11 : i64} {
  func.func @_add_pe_kernel(%arg0: i32, %arg1: i32, %arg2: memref<1x2x128xf32, #tpu.memory_space<vmem>>, %arg3: memref<1x2x128xf32, #tpu.memory_space<vmem>>, %arg4: memref<1x2x128xf32, #tpu.memory_space<vmem>>) attributes {dimension_semantics = [#tpu.dimension_semantics<parallel>, #tpu.dimension_semantics<parallel>], iteration_bounds = array<i64: 1, 2>, scalar_prefetch = 0 : i64, scratch_operands = 0 : i64, tpu.core_type = #tpu.core_type<tc>, window_params = [{transform_indices = @transform_0, window_bounds = array<i64: 1, 2, 128>}, {transform_indices = @transform_1, window_bounds = array<i64: 1, 2, 128>}, {transform_indices = @transform_2, window_bounds = array<i64: 1, 2, 128>}]} {
    %c0 = arith.constant 0 : index
    %c0_0 = arith.constant 0 : index
    %c0_1 = arith.constant 0 : index
    %0 = vector.load %arg2[%c0, %c0_0, %c0_1] : memref<1x2x128xf32, #tpu.memory_space<vmem>>, vector<1x2x128xf32>
    %c0_2 = arith.constant 0 : index
    %c0_3 = arith.constant 0 : index
    %c0_4 = arith.constant 0 : index
    %1 = vector.load %arg3[%c0_2, %c0_3, %c0_4] : memref<1x2x128xf32, #tpu.memory_space<vmem>>, vector<1x2x128xf32>
    %2 = arith.addf %0, %1 : vector<1x2x128xf32>
    %c0_5 = arith.constant 0 : index
    %c0_6 = arith.constant 0 : index
    %c0_7 = arith.constant 0 : index
    %3 = vector.load %arg4[%c0_5, %c0_6, %c0_7] : memref<1x2x128xf32, #tpu.memory_space<vmem>>, vector<1x2x128xf32>
    tpu.vector_store %arg4[%c0_5, %c0_6, %c0_7], %2 {strides = array<i32>} : memref<1x2x128xf32, #tpu.memory_space<vmem>>, vector<1x2x128xf32>,
    return
  }
  func.func @transform_0(%arg0: i32, %arg1: i32) -> (i32, i32, i32) {
    %c0_i32 = arith.constant 0 : i32
    %c0_i32_0 = arith.constant 0 : i32
    return %arg1, %arg0, %c0_i32 : i32, i32, i32
  }
  func.func @transform_1(%arg0: i32, %arg1: i32) -> (i32, i32, i32) {
    %c0_i32 = arith.constant 0 : i32
    %c0_i32_0 = arith.constant 0 : i32
    %c0_i32_1 = arith.constant 0 : i32
    return %c0_i32, %arg0, %c0_i32_0 : i32, i32, i32
  }
  func.func @transform_2(%arg0: i32, %arg1: i32) -> (i32, i32, i32) {
    %c0_i32 = arith.constant 0 : i32
    %c0_i32_0 = arith.constant 0 : i32
    return %arg1, %arg0, %c0_i32 : i32, i32, i32
  }
}

</mosaic_0001>

<bundles_post_ra>
// kernel: discrete_sincos_pos_enc.1
= control target key start
LH: loop header
LB: loop body
LE: loop exit
PB: predicated region body
PF: predicated region fallthrough
CT: control target
= control target key end

     0   :  { %s354_s9 = smov 0   ;;  %s331_s10 = smov 0   ;;  %s368_s0 = inlined_call_operand.vmem [shape: f32[2,2,128], index: 0, kind: input, shape index: {}]   ;;  %s369_s1 = inlined_call_operand.vmem [shape: f32[1,2,128], index: 1, kind: input, shape index: {}]   ;;  %s370_s2 = inlined_call_operand.vmem [shape: f32[2,2,128], index: 2, kind: output, shape index: {}]  }
   0x1   :  { %s335_s11 = smov 0  }
   0x2 LB: > { %s21_s12 = sadd.s32 1, %s333_s10  ;;  %p286_p0 = scmp.ge.s32.totalorder %s337_s11, 1  ;;  %s337_s11 = sphi %s335_s11, %s12_s11   ;;  %s333_s10 = sphi %s331_s10, %s332_s10   ;;  %s329_s9 = sphi %s354_s9, %s371_s9  }
   0x3   : > { %p22_p1 = scmp.ge.s32.totalorder %s21_s12, 2  ;;  %p139_p2 = scmp.lt.s32.totalorder %s337_s11, 3 }
   0x5   : > { %s373_s12 = smov (%p22_p1, %s21_s12), 0  ;;  %p140_p3 = pnand %p286_p0, %p139_p2 }
   0x6   : > { %p169_p4 = scmp.lt.s32.totalorder (!%p140_p3), %s329_s9, 1 }
   0x7   : > { %143 = sbr.rel (%p140_p3) target bundleno = 19 (0x13), region = 28 }
   0xc   : > { %s375_s9 = smov (!%p169_p4, %s329_s9), 1  ;;  %v188_v0 = vld [vmem:[%s369_s1] sm:$0x3] }
   0xd   : > { %s287_s13 = sshll.u32 %s375_s9, 1 }
   0xe   : > { %s175_s18 = scalar_lea.vmem %s368_s0, %s287_s13  ;;  %s186_s21 = scalar_lea.vmem %s370_s2, %s287_s13 }
   0xf   : > { %v187_v1 = vld [vmem:[%s175_s18] sm:$0x3] }
  0x10   : > { %v189_v2 = vadd.f32 %v188_v0, %v187_v1 }
  0x12   : > { %190 = vst [vmem:[%s186_s21] sm:$0x3] %v189_v2 }
  0x13 PF: > { %s12_s11 = sadd.s32 1, %s337_s11   ;;  %s371_s9 = smov %s333_s10 }
  0x14   : > { %p9_p5 = scmp.ge.s32.totalorder %s12_s11, 4   ;;  %s332_s10 = smov %s373_s12  }
  0x16   :  { %11 = sbr.rel (!%p9_p5) target bundleno = 2 (0x2), region = 61 }

</bundles_post_ra>
